<compile_context>
chip_gen: v5e
topology: v5e:2x2
jax: 0.10.0
libtpu: 0.0.40
codegen_flags: <defaults>
</compile_context>

<pallas_src>
import functools

import jax
import jax.numpy as jnp
from jax.experimental import pallas as pl
from jax.experimental.pallas import tpu as pltpu

_EPS = 1e-5
_MIN_GRID_STEPS = 4   # keep >= 4 grid steps (when rows allow) so the pipeline overlaps DMA w/ compute
_F32_TEMPS = 3        # ~3 full-tile f32 temporaries live inside the kernel body (headroom estimate)


def _layernorm_kernel(x_ref, w_ref, b_ref, o_ref):
    x = x_ref[...].astype(jnp.float32)          # (row_tile, D)
    w = w_ref[...].astype(jnp.float32)          # (1, D) -> sublane-broadcast by VPU
    b = b_ref[...].astype(jnp.float32)          # (1, D)

    mean = jnp.mean(x, axis=-1, keepdims=True)                   # (row_tile, 1)
    centered = x - mean
    var = jnp.mean(centered * centered, axis=-1, keepdims=True)  # biased variance (matches F.layer_norm)
    inv = jax.lax.rsqrt(var + _EPS)
    o_ref[...] = (centered * inv * w + b).astype(o_ref.dtype)


def _sublane_base(itemsize):
    # Minimum row granularity so blocks stay sublane-packed / (8,128)-legal.
    return {4: 8, 2: 16, 1: 32}.get(itemsize, 8)


@functools.lru_cache(maxsize=1)
def _vmem_budgets():
    """Returns (pipeline_working_set_budget, scoped_vmem_limit, target_input_bytes_per_step)."""
    try:
        cap = pltpu.get_tpu_info().vmem_capacity_bytes
    except Exception:
        cap = 64 << 20  # if the query is unavailable, assume the smallest (v7x-like) VMEM
    if cap >= (96 << 20):
        # v5e / v6e: 128 MiB VMEM per TC. Explicit scoped limit matters on v5e (16 MiB default).
        return (64 << 20, 80 << 20, 8 << 20)
    # v7x: 64 MiB per TC -> leave headroom for compiler scratch, layout padding, (1, D) params.
    return (32 << 20, 48 << 20, 4 << 20)


def _pick_row_tile(R, D, in_itemsize, out_itemsize):
    base = _sublane_base(in_itemsize)
    tile_budget, _, target_in_bytes = _vmem_budgets()

    # Per-row bytes of the pipeline working set: double-buffered input + output blocks
    # plus ~3 f32 full-tile temporaries inside the kernel body.
    per_row = D * (2 * in_itemsize + 2 * out_itemsize + _F32_TEMPS * 4)
    vmem_rows = (tile_budget // per_row) // base * base

    if vmem_rows < base:
        if R * per_row <= tile_budget:
            return R  # tiny row count: one full-extent block still fits
        # TODO(synk): add a D-tiled two-pass path (sum/sumsq accumulated across a D grid
        # axis, then a normalize pass) for hidden dims too large for a (base, D) block.
        raise ValueError(
            f"LayerNorm hidden dim D={D} is too large for a ({base}, {D}) block within the "
            f"{tile_budget >> 20} MiB VMEM pipeline budget; no D-tiled fallback implemented.")

    # Bytes-based sweet spot: each grid step should move ~target_in_bytes of input.
    target_rows = max(base, pl.cdiv(target_in_bytes, D * in_itemsize) // base * base)
    row_tile = min(target_rows, vmem_rows)

    if R < _MIN_GRID_STEPS * base:
        # Too few rows for pipelining to matter.
        return R if row_tile >= R else row_tile

    # Never collapse to one (or two) giant blocks: cap row_tile so the grid has >= 4 steps.
    steps_cap_rows = max(base, (R // _MIN_GRID_STEPS) // base * base)
    row_tile = min(row_tile, steps_cap_rows)

    # Best effort: make the step count even so the 1-D "parallel" grid splits evenly
    # across v7x's two TensorCores. Bounded search around the chosen tile.
    steps = pl.cdiv(R, row_tile)
    if steps % 2 == 1:
        best = None
        lo = max(base, row_tile - 4 * base)
        hi = min(vmem_rows, row_tile + 4 * base)
        for rt in range(lo, hi + 1, base):
            s = pl.cdiv(R, rt)
            if s >= _MIN_GRID_STEPS and s % 2 == 0:
                d = abs(rt - row_tile)
                if best is None or d < best[0]:
                    best = (d, rt)
        if best is not None:
            row_tile = best[1]

    return row_tile


def layer_norm(x, weight, bias=None, *, row_tile=None):
    """x: (..., D) — normalizes over the last dim, matching F.layer_norm(..., eps=1e-5)."""
    orig_shape = x.shape
    D = orig_shape[-1]
    x2 = x.reshape(-1, D)
    R = x2.shape[0]

    if bias is None:
        bias = jnp.zeros((D,), dtype=x.dtype)

    itemsize = jnp.dtype(x2.dtype).itemsize
    base = _sublane_base(itemsize)
    if row_tile is None:
        row_tile = _pick_row_tile(R, D, itemsize, itemsize)
    else:
        row_tile = min(row_tile, R)
        if row_tile < R and row_tile % base != 0:
            row_tile = max(base, (row_tile // base) * base)

    w2 = weight.reshape(1, D)
    b2 = bias.reshape(1, D)

    _, vmem_limit, _ = _vmem_budgets()

    # Ragged last block is handled by Pallas (rows are independent; the out-of-bounds
    # region of the last block is masked on writeback), so no HBM pad-copy is needed.
    grid = (pl.cdiv(R, row_tile),)
    # TODO(synk): for best bandwidth, keep the model's hidden dim a multiple of 128 so
    # output stores are lane-dense (unmasked vst) instead of masked partial stores.
    out = pl.pallas_call(
        _layernorm_kernel,
        out_shape=jax.ShapeDtypeStruct((R, D), x.dtype),
        grid_spec=pltpu.PrefetchScalarGridSpec(
            num_scalar_prefetch=0,
            grid=grid,
            in_specs=[
                pl.BlockSpec((row_tile, D), lambda i: (i, 0)),
                pl.BlockSpec((1, D), lambda i: (0, 0)),
                pl.BlockSpec((1, D), lambda i: (0, 0)),
            ],
            out_specs=pl.BlockSpec((row_tile, D), lambda i: (i, 0)),
        ),
        compiler_params=pltpu.CompilerParams(
            dimension_semantics=("parallel",),   # shards the row grid across TCs on v7x
            vmem_limit_bytes=vmem_limit,
        ),
    )(x2, w2, b2)

    return out.reshape(orig_shape)


def _ref_layer_norm(x, weight, bias):
    mean = jnp.mean(x, axis=-1, keepdims=True)
    var = jnp.mean((x - mean) ** 2, axis=-1, keepdims=True)
    return (x - mean) / jnp.sqrt(var + _EPS) * weight + bias


if __name__ == "__main__":
    key = jax.random.PRNGKey(0)

    # Test 1: small shape implied by the module (batch=2, seq=8, hidden=32), default tiling.
    B, S, D = 2, 8, 32
    x = jax.random.normal(key, (B, S, D), dtype=jnp.float32)
    weight = jnp.ones((D,), dtype=jnp.float32)   # nn.Parameter(torch.ones(ndim))
    bias = jnp.zeros((D,), dtype=jnp.float32)    # nn.Parameter(torch.zeros(ndim))

    y = jax.block_until_ready(layer_norm(x, weight, bias))
    ref = _ref_layer_norm(x, weight, bias)
    assert jnp.allclose(y, ref, atol=1e-5, rtol=1e-5), "mismatch vs reference (test 1)"

    # Test 2: lane-dense hidden dim with a forced multi-step grid and a ragged last block
    # (R=40 rows, row_tile=16 -> grid=3, last block partially out of bounds).
    key2 = jax.random.PRNGKey(1)
    B2, S2, D2 = 5, 8, 128
    x2 = jax.random.normal(key2, (B2, S2, D2), dtype=jnp.float32)
    w2 = jnp.linspace(0.5, 1.5, D2, dtype=jnp.float32)
    b2 = jnp.linspace(-0.1, 0.1, D2, dtype=jnp.float32)

    y2 = jax.block_until_ready(layer_norm(x2, w2, b2, row_tile=16))
    ref2 = _ref_layer_norm(x2, w2, b2)
    assert jnp.allclose(y2, ref2, atol=1e-5, rtol=1e-5), "mismatch vs reference (test 2, ragged grid)"

    print("KERNEL_OK")
</pallas_src>

<mosaic_0001>
module attributes {stable_mosaic.version = 11 : i64} {
  func.func @_layernorm_kernel(%arg0: i32, %arg1: memref<16x32xf32, #tpu.memory_space<vmem>>, %arg2: memref<1x32xf32, #tpu.memory_space<vmem>>, %arg3: memref<1x32xf32, #tpu.memory_space<vmem>>, %arg4: memref<16x32xf32, #tpu.memory_space<vmem>>) attributes {dimension_semantics = [#tpu.dimension_semantics<parallel>], iteration_bounds = array<i64: 1>, scalar_prefetch = 0 : i64, scratch_operands = 0 : i64, tpu.core_type = #tpu.core_type<tc>, window_params = [{transform_indices = @transform_0, window_bounds = array<i64: 16, 32>}, {pipeline_mode = #tpu.pipeline_mode<synchronous>, transform_indices = @transform_1, window_bounds = array<i64: 1, 32>}, {pipeline_mode = #tpu.pipeline_mode<synchronous>, transform_indices = @transform_2, window_bounds = array<i64: 1, 32>}, {transform_indices = @transform_3, window_bounds = array<i64: 16, 32>}]} {
    %c0 = arith.constant 0 : index
    %c0_0 = arith.constant 0 : index
    %0 = vector.load %arg1[%c0, %c0_0] : memref<16x32xf32, #tpu.memory_space<vmem>>, vector<16x32xf32>
    %c0_1 = arith.constant 0 : index
    %c0_2 = arith.constant 0 : index
    %1 = vector.load %arg2[%c0_1, %c0_2] : memref<1x32xf32, #tpu.memory_space<vmem>>, vector<1x32xf32>
    %c0_3 = arith.constant 0 : index
    %c0_4 = arith.constant 0 : index
    %2 = vector.load %arg3[%c0_3, %c0_4] : memref<1x32xf32, #tpu.memory_space<vmem>>, vector<1x32xf32>
    %cst = arith.constant dense<0.000000e+00> : vector<16xf32>
    %3 = vector.multi_reduction <add>, %0, %cst [1] : vector<16x32xf32> to vector<16xf32>
    %4 = vector.shape_cast %3 : vector<16xf32> to vector<16x1xf32>
    %cst_5 = arith.constant 3.200000e+01 : f32
    %5 = vector.broadcast %cst_5 : f32 to vector<16x1xf32>
    %6 = arith.divf %4, %5 : vector<16x1xf32>
    %7 = vector.broadcast %6 : vector<16x1xf32> to vector<16x32xf32>
    %8 = arith.subf %0, %7 : vector<16x32xf32>
    %9 = arith.mulf %8, %8 : vector<16x32xf32>
    %cst_6 = arith.constant dense<0.000000e+00> : vector<16xf32>
    %10 = vector.multi_reduction <add>, %9, %cst_6 [1] : vector<16x32xf32> to vector<16xf32>
    %11 = vector.shape_cast %10 : vector<16xf32> to vector<16x1xf32>
    %cst_7 = arith.constant 3.200000e+01 : f32
    %12 = vector.broadcast %cst_7 : f32 to vector<16x1xf32>
    %13 = arith.divf %11, %12 : vector<16x1xf32>
    %cst_8 = arith.constant 9.99999974E-6 : f32
    %14 = vector.broadcast %cst_8 : f32 to vector<16x1xf32>
    %15 = arith.addf %13, %14 : vector<16x1xf32>
    %16 = math.rsqrt %15 : vector<16x1xf32>
    %17 = vector.broadcast %16 : vector<16x1xf32> to vector<16x32xf32>
    %18 = arith.mulf %8, %17 : vector<16x32xf32>
    %19 = vector.broadcast %1 : vector<1x32xf32> to vector<16x32xf32>
    %20 = arith.mulf %18, %19 : vector<16x32xf32>
    %21 = vector.broadcast %2 : vector<1x32xf32> to vector<16x32xf32>
    %22 = arith.addf %20, %21 : vector<16x32xf32>
    %c0_9 = arith.constant 0 : index
    %c0_10 = arith.constant 0 : index
    %23 = vector.load %arg4[%c0_9, %c0_10] : memref<16x32xf32, #tpu.memory_space<vmem>>, vector<16x32xf32>
    tpu.vector_store %arg4[%c0_9, %c0_10], %22 {strides = array<i32>} : memref<16x32xf32, #tpu.memory_space<vmem>>, vector<16x32xf32>,
    return
  }
  func.func @transform_0(%arg0: i32) -> (i32, i32) {
    %c0_i32 = arith.constant 0 : i32
    %c0_i32_0 = arith.constant 0 : i32
    return %arg0, %c0_i32 : i32, i32
  }
  func.func @transform_1(%arg0: i32) -> (i32, i32) {
    %c0_i32 = arith.constant 0 : i32
    %c0_i32_0 = arith.constant 0 : i32
    %c0_i32_1 = arith.constant 0 : i32
    return %c0_i32, %c0_i32_0 : i32, i32
  }
  func.func @transform_2(%arg0: i32) -> (i32, i32) {
    %c0_i32 = arith.constant 0 : i32
    %c0_i32_0 = arith.constant 0 : i32
    %c0_i32_1 = arith.constant 0 : i32
    return %c0_i32, %c0_i32_0 : i32, i32
  }
  func.func @transform_3(%arg0: i32) -> (i32, i32) {
    %c0_i32 = arith.constant 0 : i32
    %c0_i32_0 = arith.constant 0 : i32
    return %arg0, %c0_i32 : i32, i32
  }
}

</mosaic_0001>

<bundles_post_ra>
// kernel: tpu_custom_call.1
= control target key start
LH: loop header
LB: loop body
LE: loop exit
PB: predicated region body
PF: predicated region fallthrough
CT: control target
= control target key end

     0   :  { %8 = vsyncpa [#allocation3], 0  ;;  %s275_s0 = inlined_call_operand.hbm [shape: f32[16,32], index: 0, kind: input, shape index: {}]   ;;  %s276_s1 = inlined_call_operand.hbm [shape: f32[1,32], index: 1, kind: input, shape index: {}]   ;;  %s277_s2 = inlined_call_operand.vmem [shape: f32[1,32], index: 2, kind: input, shape index: {}]   ;;  %s278_s3 = inlined_call_operand.hbm [shape: f32[16,32], index: 3, kind: output, shape index: {}]  }
   0x1   :  { %9 = vsyncpa [#allocation6], 0 }
   0x2   :  { %10 = vsyncpa [#allocation4], 0  ;;  %s15_s14 = sshll.u32 %s275_s0, 4  ;;  %s225_s15 = smov [#allocation2]   ;;  %s16_s14 = int_to_ptr.hbm [resolvable:$true] %s15_s14 }
   0x3   :  { %s17_s16 = sshll.u32 %s225_s15, 4  ;;  %s29_s19 = sshll.u32 %s276_s1, 4  ;;  %s18_s16 = int_to_ptr.vmem [resolvable:$true] %s17_s16  ;;  %s30_s19 = int_to_ptr.hbm [resolvable:$true] %s29_s19 }
   0x4   :  { %s226_s20 = smov 128   ;;  %s227_s21 = smov 8  }
   0x5   :  { %23 = dma.hbm_to_vmem [thread:$0]  %s16_s14, 256, %s18_s16, [#allocation3], %s226_s20, %s226_s20, %s227_s21  }
   0x6   :  { %s228_s22 = smov [#allocation5]  }
   0x7   :  { %s31_s23 = sshll.u32 %s228_s22, 4  ;;  %s32_s23 = int_to_ptr.vmem [resolvable:$true] %s31_s23 }
   0x8   :  { %34 = dma.hbm_to_vmem [thread:$0]  %s30_s19, 16, %s32_s23, [#allocation6]  }
   0x9   :  { %219 = dma.done.wait [#allocation3], 256  }
   0xa   :  { %220 = vsyncadd [#allocation3], 4294967040 }
   0xb   :  { %221 = dma.done.wait [#allocation6], 16  }
   0xc   :  { %222 = vsyncadd [#allocation6], 4294967280  ;;  %vm49_vm0 = vcmask 261120   ;;  %v45_v0 = vld [vmem:[#allocation2] sm:$0xff]  ;;  %v46_v2 = vld [vmem:[#allocation2 + $0x8] sm:$0xff]  ;;  %v229_v4 = vmov 32.0  }
   0xd   :  { %v50_v1 = vsel %vm49_vm0, %v45_v0, 0.0  ;;  %v53_v3 = vsel %vm49_vm0, %v46_v2, 0.0  ;;  %141 = vrcp.f32 %v229_v4  ;;  %v139_v35 = vld [vmem:[#allocation5] ss:$0 sm:$0xff]  ;;  %v140_v39 = vld [vmem:[%s277_s2] ss:$0 sm:$0xff] }
   0xe   :  { %51 = vadd.xlane.f32.xlu0 %v50_v1  ;;  %s230_s24 = smov [#allocation7]   ;;  %s119_s28 = sshll.u32 %s278_s3, 4  ;;  %s120_s28 = int_to_ptr.hbm [resolvable:$true] %s119_s28 }
   0xf   :  { %s117_s25 = sshll.u32 %s230_s24, 4  ;;  %s118_s25 = int_to_ptr.vmem [resolvable:$true] %s117_s25 }
  0x13   :  { %v142_v5 = vpop.eup %141 }
  0x14   :  { %v57_v6 = vmul.f32 32.0, %v142_v5  ;;  %vm61_vm1 = vweird.f32 %v142_v5 }
  0x16   :  { %54 = vadd.xlane.f32.xlu0 %v53_v3  ;;  %v58_v7 = vsub.f32 1.0, %v57_v6 }
  0x18   :  { %v59_v8 = vmul.f32 %v142_v5, %v58_v7 }
  0x1a   :  { %v60_v9 = vadd.f32 %v142_v5, %v59_v8 }
  0x1c   :  { %v62_v10 = vsel %vm61_vm1, %v142_v5, %v60_v9 }
  0x81   :  { %v52_v11 = vpop.xlane.xlu0 %51 }
  0x82   :  { %v63_v12 = vmul.f32 %v62_v10, %v52_v11 }
  0x84   :  { %v65_v13 = vsub.f32 %v45_v0, %v63_v12 }
  0x86   :  { %v67_v14 = vmul.f32 %v65_v13, %v65_v13 }
  0x88   :  { %v69_v15 = vsel %vm49_vm0, %v67_v14, 0.0 }
  0x89   :  { %70 = vadd.xlane.f32.xlu1 %v69_v15  ;;  %v55_v16 = vpop.xlane.xlu0 %54 }
  0x8a   :  { %v64_v17 = vmul.f32 %v62_v10, %v55_v16 }
  0x8c   :  { %v66_v18 = vsub.f32 %v46_v2, %v64_v17 }
  0x8e   :  { %v68_v19 = vmul.f32 %v66_v18, %v66_v18 }
  0x90   :  { %v72_v20 = vsel %vm49_vm0, %v68_v19, 0.0 }
  0x91   :  { %73 = vadd.xlane.f32.xlu1 %v72_v20 }
  0xfc   :  { %v71_v21 = vpop.xlane.xlu1 %70 }
  0xfd   :  { %v75_v22 = vmul.f32 %v71_v21, %v62_v10 }
  0xff   :  { %v77_v23 = vadd.f32 1e-05, %v75_v22 }
 0x101   :  { %143 = vrsqrt.f32 %v77_v23  ;;  %vm85_vm3 = vweird.f32 %v77_v23 }
 0x104   :  { %v74_v24 = vpop.xlane.xlu1 %73 }
 0x105   :  { %v76_v25 = vmul.f32 %v74_v24, %v62_v10 }
 0x107   :  { %v144_v26 = vpop.eup %143  ;;  %v78_v27 = vadd.f32 1e-05, %v76_v25 }
 0x108   :  { %v80_v28 = vmul.f32 %v144_v26, %v77_v23  ;;  %vm86_vm2 = vweird.f32 %v144_v26 }
 0x109   :  { %145 = vrsqrt.f32 %v78_v27  ;;  %vm87_vm4 = vmor %vm85_vm3, %vm86_vm2  ;;  %vm95_vm6 = vweird.f32 %v78_v27 }
 0x10a   :  { %v81_v29 = vmul.f32 %v144_v26, %v80_v28 }
 0x10c   :  { %v82_v30 = vmul.f32 0.5, %v81_v29 }
 0x10e   :  { %v83_v31 = vsub.f32 1.5, %v82_v30 }
 0x10f   :  { %v146_v32 = vpop.eup %145 }
 0x110   :  { %v84_v33 = vmul.f32 %v144_v26, %v83_v31  ;;  %v90_v34 = vmul.f32 %v146_v32, %v78_v27  ;;  %vm96_vm5 = vweird.f32 %v146_v32 }
 0x111   :  { %vm97_vm7 = vmor %vm95_vm6, %vm96_vm5 }
 0x112   :  { %v88_v36 = vsel %vm87_vm4, %v144_v26, %v84_v33  ;;  %v91_v37 = vmul.f32 %v146_v32, %v90_v34 }
 0x113   :  { %v99_v38 = vmul.f32 %v88_v36, %v65_v13 }
 0x114   :  { %v92_v40 = vmul.f32 0.5, %v91_v37 }
 0x115   :  { %v104_v41 = vmul.f32 %v139_v35, %v99_v38 }
 0x116   :  { %v93_v42 = vsub.f32 1.5, %v92_v40 }
 0x117   :  { %v109_v43 = vadd.f32 %v140_v39, %v104_v41 }
 0x118   :  { %v94_v44 = vmul.f32 %v146_v32, %v93_v42 }
 0x119   :  { %111 = vst.msk [vmem:[#allocation7] sm:$0xff] %vm49_vm0, %v109_v43 }
 0x11a   :  { %v98_v45 = vsel %vm97_vm7, %v146_v32, %v94_v44 }
 0x11b   :  { %v100_v46 = vmul.f32 %v98_v45, %v66_v18 }
 0x11d   :  { %v105_v47 = vmul.f32 %v139_v35, %v100_v46 }
 0x11f   :  { %v110_v48 = vadd.f32 %v140_v39, %v105_v47 }
 0x121   :  { %112 = vst.msk [vmem:[#allocation7 + $0x8] sm:$0xff] %vm49_vm0, %v110_v48 }
 0x122   :  { %125 = dma.vmem_to_hbm [thread:$0]  %s118_s25, 256, %s120_s28, [#allocation4], %s226_s20, %s226_s20, %s227_s21  }
 0x123   :  { %223 = dma.done.wait [#allocation4], 256  }
 0x124   :  { %224 = vsyncadd [#allocation4], 4294967040 }
 0x125   :  { %130 = vsyncpa [#allocation3], 1 }
 0x126   :  { %131 = vsyncpa [#allocation6], 1 }
 0x127   :  { %132 = vsyncpa [#allocation4], 1 }

</bundles_post_ra>
